<compile_context>
chip_gen: v7x
topology: tpu7x:2x2x1
jax: 0.10.0
libtpu: 0.0.40
codegen_flags: <defaults>
</compile_context>

<pallas_src>
import functools

import jax
import jax.numpy as jnp
from jax.experimental import pallas as pl
from jax.experimental.pallas import tpu as pltpu


def ffn_bow_kernel(tok_ref, emb_ref, wf_ref, bf_ref, out_ref, *, C, T):
    # tok_ref : (B, S)  int32 token ids in SMEM (batch-major; permute done in glue)
    # emb_ref : (V, C)  embedding table                          (VMEM)
    # wf_ref  : (C, NF) fused [fc1.weight.T | topic.weight.T | 0-pad], NF % 128 == 0
    # bf_ref  : (1, NF) fused [fc1.bias     | topic.bias      | 0-pad]
    # out_ref : (B, NF) fused lane-dense output: [logit | topic_logprobs | pad]
    B, S = tok_ref.shape
    V = emb_ref.shape[0]
    NF = out_ref.shape[1]

    # ---- bag-of-words counts, O(B*V) temporaries only ---------------------
    # counts[b, v] = #{s : tok[b, s] == v}
    iota_v = jax.lax.broadcasted_iota(jnp.int32, (1, V), 1)            # (1, V)

    def batch_counts(b):
        def body(s, row):
            return row + (iota_v == tok_ref[b, s]).astype(jnp.float32)
        return jax.lax.fori_loop(0, S, body,
                                 jnp.zeros((1, V), jnp.float32), unroll=True)

    counts = jnp.concatenate([batch_counts(b) for b in range(B)], axis=0)  # (B, V)

    # embed(x).sum(dim=1) == counts @ embedding_table  (single MXU matmul)
    # NOTE: on v6e/v7x this could feed the MXU bf16 operands (counts are exact
    # small integers), at the cost of >1e-4 drift from the f32 reference.
    bow = jnp.dot(counts, emb_ref[...],
                  preferred_element_type=jnp.float32)                  # (B, C)

    # Fused fc1 + topic linear: one MXU weight push, one bias add.
    y = jnp.dot(bow, wf_ref[...],
                preferred_element_type=jnp.float32) + bf_ref[...]      # (B, NF)

    # log_softmax over the topic columns only (lane mask keeps the result
    # full-width so a single unmasked (B, NF) store is emitted; logit and pad
    # columns pass through unchanged -- pad columns are exactly 0).
    col = jax.lax.broadcasted_iota(jnp.int32, (B, NF), 1)
    topic_mask = jnp.logical_and(col >= C, col < C + T)
    neg_inf = jnp.float32(-jnp.inf)
    m = jnp.max(jnp.where(topic_mask, y, neg_inf), axis=-1, keepdims=True)
    e = jnp.where(topic_mask, jnp.exp(y - m), 0.0)
    lse = jnp.log(jnp.sum(e, axis=-1, keepdims=True))
    out_ref[...] = jnp.where(topic_mask, y - m - lse, y)


def ffn_bow_text(tokens_sb, embed_table, w1t, b1, w2t, b2):
    """tokens_sb: (seq, batch) int32, matching the torch input layout.

    Returns (logit, None, topic_logprobs) like the PyTorch module.
    """
    S, B = tokens_sb.shape
    V, C = embed_table.shape
    T = w2t.shape[1]
    NF = ((C + T + 127) // 128) * 128          # lane-dense fused output width

    # Tiny layout glue: batch-major int32 ids (SMEM-resident in the kernel).
    tok_bs = jnp.transpose(tokens_sb, (1, 0)).astype(jnp.int32)        # (B, S)

    # Fused, zero-padded weights/bias: cols [0:C] = fc1, [C:C+T] = topic linear.
    w_fused = jnp.zeros((C, NF), jnp.float32)
    w_fused = w_fused.at[:, :C].set(w1t).at[:, C:C + T].set(w2t)
    b_fused = jnp.zeros((1, NF), jnp.float32)
    b_fused = b_fused.at[:, :C].set(b1).at[:, C:C + T].set(b2)

    vmem = pl.BlockSpec(memory_space=pltpu.MemorySpace.VMEM)
    smem = pl.BlockSpec(memory_space=pltpu.MemorySpace.SMEM)

    flops = 2 * B * V * C + 2 * B * C * NF
    bytes_accessed = 4 * (tok_bs.size + embed_table.size
                          + w_fused.size + b_fused.size + B * NF)

    fused = pl.pallas_call(
        functools.partial(ffn_bow_kernel, C=C, T=T),
        out_shape=jax.ShapeDtypeStruct((B, NF), jnp.float32),
        in_specs=[smem, vmem, vmem, vmem],
        out_specs=vmem,
        cost_estimate=pl.CostEstimate(flops=flops,
                                      transcendentals=B * NF,
                                      bytes_accessed=bytes_accessed),
    )(tok_bs, embed_table, w_fused, b_fused)

    logit = fused[:, :C]
    logp = fused[:, C:C + T]
    # Module returns (logit, None, topic_logprobs); the None is produced here.
    return logit, None, logp


def reference(tokens_sb, embed_table, w1t, b1, w2t, b2):
    x = jnp.transpose(tokens_sb, (1, 0))                    # (B, S)
    bow = embed_table[x].sum(axis=1)                        # (B, C)
    logit = jnp.dot(bow, w1t, precision="highest") + b1
    tl = jnp.dot(bow, w2t, precision="highest") + b2
    logp = jax.nn.log_softmax(tl, axis=-1)
    return logit, logp


if __name__ == "__main__":
    SEQ, BATCH = 8, 2
    V, D, C, T = 128, 32, 32, 16   # embed_num, embed_dim, nlabels, num_topics
    assert D == C  # required by the PyTorch module (fc1 consumes embed(...).sum)

    key = jax.random.PRNGKey(0)
    k_tok, k_emb, k_w1, k_b1, k_w2, k_b2 = jax.random.split(key, 6)

    # torch-input layout: (seq, batch) integer token ids
    tokens = jax.random.randint(k_tok, (SEQ, BATCH), 0, V, dtype=jnp.int32)

    embed_table = jax.random.normal(k_emb, (V, C), dtype=jnp.float32)

    # nn.Linear(D, C): weight (C, D), bias (C,)  -> store W1 = weight.T  (D, C)
    bound1 = 1.0 / (D ** 0.5)
    w1t = jax.random.uniform(k_w1, (D, C), jnp.float32, -bound1, bound1)
    b1 = jax.random.uniform(k_b1, (C,), jnp.float32, -bound1, bound1)
    # nn.Linear(D, T): weight (T, D), bias (T,)  -> store W2 = weight.T  (D, T)
    w2t = jax.random.uniform(k_w2, (D, T), jnp.float32, -bound1, bound1)
    b2 = jax.random.uniform(k_b2, (T,), jnp.float32, -bound1, bound1)

    logit, none_out, logp = ffn_bow_text(tokens, embed_table, w1t, b1, w2t, b2)
    jax.block_until_ready((logit, logp))

    logit_ref, logp_ref = reference(tokens, embed_table, w1t, b1, w2t, b2)
    assert none_out is None
    assert logit.shape == (BATCH, C)
    assert logp.shape == (BATCH, T)
    assert jnp.allclose(logit, logit_ref, atol=1e-4, rtol=1e-4)
    assert jnp.allclose(logp, logp_ref, atol=1e-4, rtol=1e-4)

    print("KERNEL_OK")
</pallas_src>

<mosaic_0001>
module attributes {stable_mosaic.version = 11 : i64} {
  func.func @ffn_bow_kernel(%arg0: memref<2x8xi32, #tpu.memory_space<smem>>, %arg1: memref<128x32xf32, #tpu.memory_space<vmem>>, %arg2: memref<32x128xf32, #tpu.memory_space<vmem>>, %arg3: memref<1x128xf32, #tpu.memory_space<vmem>>, %arg4: memref<2x128xf32, #tpu.memory_space<vmem>>) attributes {dimension_semantics = [], scalar_prefetch = 0 : i64, scratch_operands = 0 : i64, tpu.core_type = #tpu.core_type<tc>} {
    %0 = tpu.iota {dimensions = array<i32: 1>} : vector<1x128xi32>
    %cst = arith.constant 0.000000e+00 : f32
    %1 = vector.broadcast %cst : f32 to vector<1x128xf32>
    %c0_i32 = arith.constant 0 : i32
    %c0 = arith.constant 0 : index
    %2 = arith.index_cast %c0_i32 : i32 to index
    %3 = memref.load %arg0[%c0, %2] : memref<2x8xi32, #tpu.memory_space<smem>>
    %4 = vector.broadcast %3 : i32 to vector<1x128xi32>
    %5 = arith.cmpi eq, %0, %4 : vector<1x128xi32>
    %6 = arith.extui %5 : vector<1x128xi1> to vector<1x128xi32>
    %7 = arith.sitofp %6 : vector<1x128xi32> to vector<1x128xf32>
    %8 = arith.addf %1, %7 : vector<1x128xf32>
    %c1_i32 = arith.constant 1 : i32
    %c0_0 = arith.constant 0 : index
    %9 = arith.index_cast %c1_i32 : i32 to index
    %10 = memref.load %arg0[%c0_0, %9] : memref<2x8xi32, #tpu.memory_space<smem>>
    %11 = vector.broadcast %10 : i32 to vector<1x128xi32>
    %12 = arith.cmpi eq, %0, %11 : vector<1x128xi32>
    %13 = arith.extui %12 : vector<1x128xi1> to vector<1x128xi32>
    %14 = arith.sitofp %13 : vector<1x128xi32> to vector<1x128xf32>
    %15 = arith.addf %8, %14 : vector<1x128xf32>
    %c2_i32 = arith.constant 2 : i32
    %c0_1 = arith.constant 0 : index
    %16 = arith.index_cast %c2_i32 : i32 to index
    %17 = memref.load %arg0[%c0_1, %16] : memref<2x8xi32, #tpu.memory_space<smem>>
    %18 = vector.broadcast %17 : i32 to vector<1x128xi32>
    %19 = arith.cmpi eq, %0, %18 : vector<1x128xi32>
    %20 = arith.extui %19 : vector<1x128xi1> to vector<1x128xi32>
    %21 = arith.sitofp %20 : vector<1x128xi32> to vector<1x128xf32>
    %22 = arith.addf %15, %21 : vector<1x128xf32>
    %c3_i32 = arith.constant 3 : i32
    %c0_2 = arith.constant 0 : index
    %23 = arith.index_cast %c3_i32 : i32 to index
    %24 = memref.load %arg0[%c0_2, %23] : memref<2x8xi32, #tpu.memory_space<smem>>
    %25 = vector.broadcast %24 : i32 to vector<1x128xi32>
    %26 = arith.cmpi eq, %0, %25 : vector<1x128xi32>
    %27 = arith.extui %26 : vector<1x128xi1> to vector<1x128xi32>
    %28 = arith.sitofp %27 : vector<1x128xi32> to vector<1x128xf32>
    %29 = arith.addf %22, %28 : vector<1x128xf32>
    %c4_i32 = arith.constant 4 : i32
    %c0_3 = arith.constant 0 : index
    %30 = arith.index_cast %c4_i32 : i32 to index
    %31 = memref.load %arg0[%c0_3, %30] : memref<2x8xi32, #tpu.memory_space<smem>>
    %32 = vector.broadcast %31 : i32 to vector<1x128xi32>
    %33 = arith.cmpi eq, %0, %32 : vector<1x128xi32>
    %34 = arith.extui %33 : vector<1x128xi1> to vector<1x128xi32>
    %35 = arith.sitofp %34 : vector<1x128xi32> to vector<1x128xf32>
    %36 = arith.addf %29, %35 : vector<1x128xf32>
    %c5_i32 = arith.constant 5 : i32
    %c0_4 = arith.constant 0 : index
    %37 = arith.index_cast %c5_i32 : i32 to index
    %38 = memref.load %arg0[%c0_4, %37] : memref<2x8xi32, #tpu.memory_space<smem>>
    %39 = vector.broadcast %38 : i32 to vector<1x128xi32>
    %40 = arith.cmpi eq, %0, %39 : vector<1x128xi32>
    %41 = arith.extui %40 : vector<1x128xi1> to vector<1x128xi32>
    %42 = arith.sitofp %41 : vector<1x128xi32> to vector<1x128xf32>
    %43 = arith.addf %36, %42 : vector<1x128xf32>
    %c6_i32 = arith.constant 6 : i32
    %c0_5 = arith.constant 0 : index
    %44 = arith.index_cast %c6_i32 : i32 to index
    %45 = memref.load %arg0[%c0_5, %44] : memref<2x8xi32, #tpu.memory_space<smem>>
    %46 = vector.broadcast %45 : i32 to vector<1x128xi32>
    %47 = arith.cmpi eq, %0, %46 : vector<1x128xi32>
    %48 = arith.extui %47 : vector<1x128xi1> to vector<1x128xi32>
    %49 = arith.sitofp %48 : vector<1x128xi32> to vector<1x128xf32>
    %50 = arith.addf %43, %49 : vector<1x128xf32>
    %c7_i32 = arith.constant 7 : i32
    %c0_6 = arith.constant 0 : index
    %51 = arith.index_cast %c7_i32 : i32 to index
    %52 = memref.load %arg0[%c0_6, %51] : memref<2x8xi32, #tpu.memory_space<smem>>
    %53 = vector.broadcast %52 : i32 to vector<1x128xi32>
    %54 = arith.cmpi eq, %0, %53 : vector<1x128xi32>
    %55 = arith.extui %54 : vector<1x128xi1> to vector<1x128xi32>
    %56 = arith.sitofp %55 : vector<1x128xi32> to vector<1x128xf32>
    %57 = arith.addf %50, %56 : vector<1x128xf32>
    %c8_i32 = arith.constant 8 : i32
    %cst_7 = arith.constant 0.000000e+00 : f32
    %58 = vector.broadcast %cst_7 : f32 to vector<1x128xf32>
    %c0_i32_8 = arith.constant 0 : i32
    %c1 = arith.constant 1 : index
    %59 = arith.index_cast %c0_i32_8 : i32 to index
    %60 = memref.load %arg0[%c1, %59] : memref<2x8xi32, #tpu.memory_space<smem>>
    %61 = vector.broadcast %60 : i32 to vector<1x128xi32>
    %62 = arith.cmpi eq, %0, %61 : vector<1x128xi32>
    %63 = arith.extui %62 : vector<1x128xi1> to vector<1x128xi32>
    %64 = arith.sitofp %63 : vector<1x128xi32> to vector<1x128xf32>
    %65 = arith.addf %58, %64 : vector<1x128xf32>
    %c1_i32_9 = arith.constant 1 : i32
    %c1_10 = arith.constant 1 : index
    %66 = arith.index_cast %c1_i32_9 : i32 to index
    %67 = memref.load %arg0[%c1_10, %66] : memref<2x8xi32, #tpu.memory_space<smem>>
    %68 = vector.broadcast %67 : i32 to vector<1x128xi32>
    %69 = arith.cmpi eq, %0, %68 : vector<1x128xi32>
    %70 = arith.extui %69 : vector<1x128xi1> to vector<1x128xi32>
    %71 = arith.sitofp %70 : vector<1x128xi32> to vector<1x128xf32>
    %72 = arith.addf %65, %71 : vector<1x128xf32>
    %c2_i32_11 = arith.constant 2 : i32
    %c1_12 = arith.constant 1 : index
    %73 = arith.index_cast %c2_i32_11 : i32 to index
    %74 = memref.load %arg0[%c1_12, %73] : memref<2x8xi32, #tpu.memory_space<smem>>
    %75 = vector.broadcast %74 : i32 to vector<1x128xi32>
    %76 = arith.cmpi eq, %0, %75 : vector<1x128xi32>
    %77 = arith.extui %76 : vector<1x128xi1> to vector<1x128xi32>
    %78 = arith.sitofp %77 : vector<1x128xi32> to vector<1x128xf32>
    %79 = arith.addf %72, %78 : vector<1x128xf32>
    %c3_i32_13 = arith.constant 3 : i32
    %c1_14 = arith.constant 1 : index
    %80 = arith.index_cast %c3_i32_13 : i32 to index
    %81 = memref.load %arg0[%c1_14, %80] : memref<2x8xi32, #tpu.memory_space<smem>>
    %82 = vector.broadcast %81 : i32 to vector<1x128xi32>
    %83 = arith.cmpi eq, %0, %82 : vector<1x128xi32>
    %84 = arith.extui %83 : vector<1x128xi1> to vector<1x128xi32>
    %85 = arith.sitofp %84 : vector<1x128xi32> to vector<1x128xf32>
    %86 = arith.addf %79, %85 : vector<1x128xf32>
    %c4_i32_15 = arith.constant 4 : i32
    %c1_16 = arith.constant 1 : index
    %87 = arith.index_cast %c4_i32_15 : i32 to index
    %88 = memref.load %arg0[%c1_16, %87] : memref<2x8xi32, #tpu.memory_space<smem>>
    %89 = vector.broadcast %88 : i32 to vector<1x128xi32>
    %90 = arith.cmpi eq, %0, %89 : vector<1x128xi32>
    %91 = arith.extui %90 : vector<1x128xi1> to vector<1x128xi32>
    %92 = arith.sitofp %91 : vector<1x128xi32> to vector<1x128xf32>
    %93 = arith.addf %86, %92 : vector<1x128xf32>
    %c5_i32_17 = arith.constant 5 : i32
    %c1_18 = arith.constant 1 : index
    %94 = arith.index_cast %c5_i32_17 : i32 to index
    %95 = memref.load %arg0[%c1_18, %94] : memref<2x8xi32, #tpu.memory_space<smem>>
    %96 = vector.broadcast %95 : i32 to vector<1x128xi32>
    %97 = arith.cmpi eq, %0, %96 : vector<1x128xi32>
    %98 = arith.extui %97 : vector<1x128xi1> to vector<1x128xi32>
    %99 = arith.sitofp %98 : vector<1x128xi32> to vector<1x128xf32>
    %100 = arith.addf %93, %99 : vector<1x128xf32>
    %c6_i32_19 = arith.constant 6 : i32
    %c1_20 = arith.constant 1 : index
    %101 = arith.index_cast %c6_i32_19 : i32 to index
    %102 = memref.load %arg0[%c1_20, %101] : memref<2x8xi32, #tpu.memory_space<smem>>
    %103 = vector.broadcast %102 : i32 to vector<1x128xi32>
    %104 = arith.cmpi eq, %0, %103 : vector<1x128xi32>
    %105 = arith.extui %104 : vector<1x128xi1> to vector<1x128xi32>
    %106 = arith.sitofp %105 : vector<1x128xi32> to vector<1x128xf32>
    %107 = arith.addf %100, %106 : vector<1x128xf32>
    %c7_i32_21 = arith.constant 7 : i32
    %c1_22 = arith.constant 1 : index
    %108 = arith.index_cast %c7_i32_21 : i32 to index
    %109 = memref.load %arg0[%c1_22, %108] : memref<2x8xi32, #tpu.memory_space<smem>>
    %110 = vector.broadcast %109 : i32 to vector<1x128xi32>
    %111 = arith.cmpi eq, %0, %110 : vector<1x128xi32>
    %112 = arith.extui %111 : vector<1x128xi1> to vector<1x128xi32>
    %113 = arith.sitofp %112 : vector<1x128xi32> to vector<1x128xf32>
    %114 = arith.addf %107, %113 : vector<1x128xf32>
    %c8_i32_23 = arith.constant 8 : i32
    %115 = tpu.concatenate %57, %114 in 0 : vector<1x128xf32>, vector<1x128xf32> -> vector<2x128xf32>
    %c0_24 = arith.constant 0 : index
    %c0_25 = arith.constant 0 : index
    %116 = vector.load %arg1[%c0_24, %c0_25] : memref<128x32xf32, #tpu.memory_space<vmem>>, vector<128x32xf32>
    %cst_26 = arith.constant dense<0.000000e+00> : vector<2x32xf32>
    %117 = tpu.matmul %115, %116, %cst_26 {dimension_numbers = #tpu.dot_dimension_numbers<[1], [0], [0], [1], [0, 0, 1, 1], [], []>} : vector<2x128xf32>, vector<128x32xf32>, vector<2x32xf32> -> vector<2x32xf32>
    %c0_27 = arith.constant 0 : index
    %c0_28 = arith.constant 0 : index
    %118 = vector.load %arg2[%c0_27, %c0_28] : memref<32x128xf32, #tpu.memory_space<vmem>>, vector<32x128xf32>
    %cst_29 = arith.constant dense<0.000000e+00> : vector<2x128xf32>
    %119 = tpu.matmul %117, %118, %cst_29 {dimension_numbers = #tpu.dot_dimension_numbers<[1], [0], [0], [1], [0, 0, 1, 1], [], []>} : vector<2x32xf32>, vector<32x128xf32>, vector<2x128xf32> -> vector<2x128xf32>
    %c0_30 = arith.constant 0 : index
    %c0_31 = arith.constant 0 : index
    %120 = vector.load %arg3[%c0_30, %c0_31] : memref<1x128xf32, #tpu.memory_space<vmem>>, vector<1x128xf32>
    %121 = vector.broadcast %120 : vector<1x128xf32> to vector<2x128xf32>
    %122 = arith.addf %119, %121 : vector<2x128xf32>
    %123 = tpu.iota {dimensions = array<i32: 1>} : vector<2x128xi32>
    %c32_i32 = arith.constant 32 : i32
    %124 = vector.broadcast %c32_i32 : i32 to vector<2x128xi32>
    %125 = arith.cmpi sge, %123, %124 : vector<2x128xi32>
    %c48_i32 = arith.constant 48 : i32
    %126 = vector.broadcast %c48_i32 : i32 to vector<2x128xi32>
    %127 = arith.cmpi slt, %123, %126 : vector<2x128xi32>
    %128 = arith.andi %125, %127 : vector<2x128xi1>
    %cst_32 = arith.constant 0xFF800000 : f32
    %129 = vector.broadcast %cst_32 : f32 to vector<2x128xf32>
    %130 = arith.select %128, %122, %129 : vector<2x128xi1>, vector<2x128xf32>
    %cst_33 = arith.constant dense<0xFF800000> : vector<2xf32>
    %131 = vector.multi_reduction <maximumf>, %130, %cst_33 [1] : vector<2x128xf32> to vector<2xf32>
    %132 = vector.shape_cast %131 : vector<2xf32> to vector<2x1xf32>
    %133 = vector.broadcast %132 : vector<2x1xf32> to vector<2x128xf32>
    %134 = arith.subf %122, %133 : vector<2x128xf32>
    %135 = math.exp %134 : vector<2x128xf32>
    %cst_34 = arith.constant 0.000000e+00 : f32
    %136 = vector.broadcast %cst_34 : f32 to vector<2x128xf32>
    %137 = arith.select %128, %135, %136 : vector<2x128xi1>, vector<2x128xf32>
    %cst_35 = arith.constant dense<0.000000e+00> : vector<2xf32>
    %138 = vector.multi_reduction <add>, %137, %cst_35 [1] : vector<2x128xf32> to vector<2xf32>
    %139 = vector.shape_cast %138 : vector<2xf32> to vector<2x1xf32>
    %140 = math.log %139 : vector<2x1xf32>
    %141 = vector.broadcast %132 : vector<2x1xf32> to vector<2x128xf32>
    %142 = arith.subf %122, %141 : vector<2x128xf32>
    %143 = vector.broadcast %140 : vector<2x1xf32> to vector<2x128xf32>
    %144 = arith.subf %142, %143 : vector<2x128xf32>
    %145 = arith.select %128, %144, %122 : vector<2x128xi1>, vector<2x128xf32>
    %c0_36 = arith.constant 0 : index
    %c0_37 = arith.constant 0 : index
    %146 = vector.load %arg4[%c0_36, %c0_37] : memref<2x128xf32, #tpu.memory_space<vmem>>, vector<2x128xf32>
    tpu.vector_store %arg4[%c0_36, %c0_37], %145 {strides = array<i32>} : memref<2x128xf32, #tpu.memory_space<vmem>>, vector<2x128xf32>,
    return
  }
}

</mosaic_0001>

<bundles_post_ra>
// kernel: tpu_custom_call.1
= control target key start
LH: loop header
LB: loop body
LE: loop exit
PB: predicated region body
PF: predicated region fallthrough
CT: control target
= control target key end

     0   :  { %9 = vsyncpa [#allocation4], 0  ;;  %s735_s0 = inlined_call_operand.vmem [shape: s32[2,8], index: 0, kind: input, shape index: {}]   ;;  %s736_s1 = inlined_call_operand.vmem [shape: f32[128,32], index: 1, kind: input, shape index: {}]   ;;  %s737_s2 = inlined_call_operand.vmem [shape: f32[32,128], index: 2, kind: input, shape index: {}]   ;;  %s738_s3 = inlined_call_operand.vmem [shape: f32[1,128], index: 3, kind: input, shape index: {}]   ;;  %s739_s4 = inlined_call_operand.hbm [shape: f32[2,128], index: 4, kind: output, shape index: {}]  }
   0x1   :  { %10 = vsyncpa [#allocation3], 0  ;;  %s17_s17 = sshll.u32 %s735_s0, 4  ;;  %s18_s17 = int_to_ptr.vmem [resolvable:$true] %s17_s17 }
   0x2   :  { %s477_s18 = scalar_lea.vmem %s18_s17, 32  ;;  %p482_p1 = scmp.lt.s32.totalorder %s18_s17, %s18_s17 }
   0x3   :  { %p478_p0 = scmp.ne.s32.totalorder %s18_s17, %s477_s18  ;;  %p483_p2 = scmp.lt.s32.totalorder %s477_s18, %s477_s18 }
   0x5   :  { %p484_p3 = por %p483_p2, %p482_p1 }
   0x7   :  { %p485_p4 = pnand %p484_p3, %p478_p0 }
   0x9   :  { %488 = shalt.err (!%p485_p4)
}
   0xa   :  { %s515_s19 = smov [#allocation2]  }
   0xb   :  { %20 = dma.vmem_to_smem %s18_s17, 32, %s515_s19, [#allocation4]  }
   0xc   :  { %511 = dma.done.wait [#allocation4], 32  }
   0xd   :  { %512 = vsyncadd [#allocation4], 4294967264 }
   0xe   :  { %30 = sfence }
   0xf   :  { %v131_v0 = vld [vmem:[%s736_s1] sm:$0xff]  ;;  %v132_v1 = vld [vmem:[%s736_s1 + $0x8] sm:$0xff]  ;;  %v133_v2 = vld [vmem:[%s736_s1 + $0x10] sm:$0xff]  ;;  %v31_v3 = vlaneseq  ;;  %v516_v4 = vmov 0.0|0.0   ;;  %vm517_vm0 = vmmov 0   ;;  %v518_v7 = vmov 0.0  }
  0x10   :  { %438 = vmatprep.subr.bf16.mxu0 %v516_v4  ;;  %v439_v5 = vpack.c.bf16 %v132_v1, %v131_v0  ;;  %v134_v6 = vld [vmem:[%s736_s1 + $0x18] sm:$0xff]  ;;  %424 = vmatprep.mubr.msk.f32.mxu0 %vm517_vm0, %v518_v7  ;;  %s33_s27 = sld [smem:[#allocation2]]  ;;  %s562_s28 = sld [smem:[#allocation2 + $0x1]]  ;;  %v135_v9 = vld [vmem:[%s736_s1 + $0x20] sm:$0xff]  ;;  %v136_v10 = vld [vmem:[%s736_s1 + $0x28] sm:$0xff] }
  0x11   :  { %462 = vmatprep.subr.bf16.mxu1 %v516_v4  ;;  %435 = vmatprep.mubr.msk.f32.mxu1 %vm517_vm0, %v518_v7  ;;  %v442_v8 = vpack.c.bf16 %v134_v6, %v133_v2  ;;  %s566_s29 = sld [smem:[#allocation2 + $0x2]]  ;;  %v575_v11 = vand.u32 127, %v31_v3  ;;  %s577_s8 = sld [smem:[#allocation2 + $0x3]]  ;;  %v217_v12 = vld [vmem:[%s737_s2] sm:$0xff]  ;;  %v137_v13 = vld [vmem:[%s736_s1 + $0x30] sm:$0xff]  ;;  %v218_v14 = vld [vmem:[%s737_s2 + $0x8] sm:$0xff]  ;;  %v445_v16 = vpack.c.bf16 %v136_v10, %v135_v9 }
  0x12   :  { %440 = vmatpush3.bf16.msra.mxu0 %v439_v5  ;;  %s579_s9 = sld [smem:[#allocation2 + $0x4]]  ;;  %s581_s10 = sld [smem:[#allocation2 + $0x5]]  ;;  %v219_v15 = vld [vmem:[%s737_s2 + $0x10] sm:$0xff]  ;;  %v138_v17 = vld [vmem:[%s736_s1 + $0x38] sm:$0xff]  ;;  %v463_v19 = vpack.c.bf16 %v218_v14, %v217_v12  ;;  %v139_v26 = vld [vmem:[%s736_s1 + $0x40] sm:$0xff] }
  0x13   :  { %441 = vmatprep.subr.bf16.mxu0 %v516_v4  ;;  %s589_s15 = sld [smem:[#allocation2 + $0x6]]  ;;  %s600_s22 = sld [smem:[#allocation2 + $0x80]]  ;;  %v220_v20 = vld [vmem:[%s737_s2 + $0x18] sm:$0xff]  ;;  %v448_v25 = vpack.c.bf16 %v138_v17, %v137_v13  ;;  %v140_v27 = vld [vmem:[%s736_s1 + $0x48] sm:$0xff]  ;;  %v626_v28 = vld [vmem:[%s736_s1 + $0x50] sm:$0xff] }
  0x14   :  { %s602_s23 = sld [smem:[#allocation2 + $0x81]]  ;;  %s610_s25 = sld [smem:[#allocation2 + $0x82]]  ;;  %464 = vmatpush3.bf16.msra.mxu1 %v463_v19  ;;  %v466_v24 = vpack.c.bf16 %v220_v20, %v219_v15  ;;  %v142_v31 = vld [vmem:[%s736_s1 + $0x58] sm:$0xff]  ;;  %v451_v39 = vpack.c.bf16 %v140_v27, %v139_v26  ;;  %v143_v58 = vld [vmem:[%s736_s1 + $0x60] sm:$0xff]  ;;  %v144_v59 = vld [vmem:[%s736_s1 + $0x68] sm:$0xff] }
  0x15   :  { %s615_s26 = sld [smem:[#allocation2 + $0x83]]  ;;  %465 = vmatprep.subr.bf16.mxu1 %v516_v4  ;;  %s640_s12 = sld [smem:[#allocation2 + $0x7]]  ;;  %v454_v40 = vpack.c.bf16 %v142_v31, %v626_v28  ;;  %v457_v3 = vpack.c.bf16 %v144_v59, %v143_v58  ;;  %v145_v6 = vld [vmem:[%s736_s1 + $0x70] sm:$0xff] }
  0x16   :  { %443 = vmatpush3.bf16.msra.mxu0 %v442_v8  ;;  %v34_v18 = vstv %s33_s27  ;;  %v40_v21 = vstv %s562_s28  ;;  %s642_s13 = sld [smem:[#allocation2 + $0x85]]  ;;  %v146_v8 = vld [vmem:[%s736_s1 + $0x78] sm:$0xff] }
  0x17   :  { %444 = vmatprep.subr.bf16.mxu0 %v516_v4  ;;  %vm35_vm1 = vcmp.eq.s32.totalorder %v575_v11, %v34_v18  ;;  %vm41_vm2 = vcmp.eq.s32.totalorder %v575_v11, %v40_v21  ;;  %v46_v23 = vstv %s566_s29  ;;  %v52_v30 = vstv %s577_s8  ;;  %s631_s29 = sld [smem:[#allocation2 + $0x84]]  ;;  %s649_s8 = sld [smem:[#allocation2 + $0x86]] }
  0x18   :  { %v337_v22 = vsel %vm35_vm1, 1.0, %v518_v7  ;;  %v339_v29 = vsel %vm41_vm2, 1.0, %v518_v7  ;;  %vm47_vm3 = vcmp.eq.s32.totalorder %v575_v11, %v46_v23  ;;  %vm53_vm4 = vcmp.eq.s32.totalorder %v575_v11, %v52_v30  ;;  %467 = vmatpush3.bf16.msra.mxu1 %v466_v24 }
  0x19   :  { %v44_v32 = vadd.f32 %v339_v29, %v337_v22  ;;  %v341_v33 = vsel %vm47_vm3, 1.0, %v518_v7  ;;  %v58_v34 = vstv %s579_s9  ;;  %v343_v35 = vsel %vm53_vm4, 1.0, %v518_v7  ;;  %s652_s9 = sld [smem:[#allocation2 + $0x87]] }
  0x1a   :  { %446 = vmatpush3.bf16.msra.mxu0 %v445_v16  ;;  %vm59_vm5 = vcmp.eq.s32.totalorder %v575_v11, %v58_v34  ;;  %v64_v36 = vstv %s581_s10  ;;  %v70_v37 = vstv %s589_s15  ;;  %v82_v42 = vstv %s600_s22 }
  0x1b   :  { %447 = vmatprep.subr.bf16.mxu0 %v516_v4  ;;  %v50_v38 = vadd.f32 %v341_v33, %v44_v32  ;;  %vm65_vm6 = vcmp.eq.s32.totalorder %v575_v11, %v64_v36  ;;  %v345_v41 = vsel %vm59_vm5, 1.0, %v518_v7  ;;  %vm658_vm7 = vcmp.eq.s32.totalorder %v575_v11, %v70_v37 }
  0x1c   :  { %vm83_vm8 = vcmp.eq.s32.totalorder %v575_v11, %v82_v42  ;;  %v88_v45 = vstv %s602_s23  ;;  %v347_v46 = vsel %vm65_vm6, 1.0, %v518_v7  ;;  %v94_v48 = vstv %s610_s25 }
  0x1d   :  { %v56_v43 = vadd.f32 %v343_v35, %v50_v38  ;;  %v353_v47 = vsel %vm83_vm8, 1.0, %v518_v7  ;;  %vm89_vm9 = vcmp.eq.s32.totalorder %v575_v11, %v88_v45  ;;  %vm95_vm10 = vcmp.eq.s32.totalorder %v575_v11, %v94_v48 }
  0x1e   :  { %449 = vmatpush3.bf16.msra.mxu0 %v448_v25  ;;  %v355_v50 = vsel %vm89_vm9, 1.0, %v518_v7  ;;  %v100_v51 = vstv %s615_s26  ;;  %v357_v53 = vsel %vm95_vm10, 1.0, %v518_v7  ;;  %v106_v54 = vstv %s631_s29 }
  0x1f   :  { %450 = vmatprep.subr.bf16.mxu0 %v516_v4  ;;  %v62_v49 = vadd.f32 %v345_v41, %v56_v43  ;;  %v92_v52 = vadd.f32 %v355_v50, %v353_v47  ;;  %vm101_vm11 = vcmp.eq.s32.totalorder %v575_v11, %v100_v51  ;;  %v76_v55 = vstv %s640_s12 }
  0x20   :  { %v359_v56 = vsel %vm101_vm11, 1.0, %v518_v7  ;;  %vm107_vm12 = vcmp.eq.s32.totalorder %v575_v11, %v106_v54  ;;  %v112_v57 = vstv %s642_s13  ;;  %v118_v62 = vstv %s649_s8 }
  0x21   :  { %v68_v60 = vadd.f32 %v347_v46, %v62_v49  ;;  %v98_v61 = vadd.f32 %v357_v53, %v92_v52  ;;  %vm113_vm13 = vcmp.eq.s32.totalorder %v575_v11, %v112_v57  ;;  %v349_v63 = vsel %vm658_vm7, 1.0, %v518_v7 }
  0x22   :  { %452 = vmatpush3.bf16.msra.mxu0 %v451_v39  ;;  %v361_v0 = vsel %vm107_vm12, 1.0, %v518_v7  ;;  %v124_v1 = vstv %s652_s9  ;;  %vm77_vm14 = vcmp.eq.s32.totalorder %v575_v11, %v76_v55  ;;  %vm119_vm15 = vcmp.eq.s32.totalorder %v575_v11, %v118_v62 }
  0x23   :  { %453 = vmatprep.subr.bf16.mxu0 %v516_v4  ;;  %v104_v2 = vadd.f32 %v359_v56, %v98_v61  ;;  %v363_v5 = vsel %vm113_vm13, 1.0, %v518_v7  ;;  %v74_v9 = vadd.f32 %v349_v63, %v68_v60  ;;  %vm125_vm0 = vcmp.eq.s32.totalorder %v575_v11, %v124_v1 }
  0x24   :  { %v351_v12 = vsel %vm77_vm14, 1.0, %v518_v7  ;;  %v365_v13 = vsel %vm119_vm15, 1.0, %v518_v7  ;;  %v460_v15 = vpack.c.bf16 %v146_v8, %v145_v6  ;;  %v367_v16 = vsel %vm125_vm0, 1.0, %v518_v7  ;;  %v368_v7 = vld [vmem:[%s738_s3] ss:$0 sm:$0xff]  ;;  %s519_s3 = smov [#allocation5]  }
  0x25   :  { %v110_v10 = vadd.f32 %v361_v0, %v104_v2  ;;  %v80_v17 = vadd.f32 %v351_v12, %v74_v9  ;;  %vm129_vm1 = vcmask 1040384   ;;  %vm228_vm2 = vcmask 261120   ;;  %s328_s22 = sshll.u32 %s519_s3, 4  ;;  %s329_s22 = int_to_ptr.vmem [resolvable:$true] %s328_s22 }
  0x26   :  { %455 = vmatpush3.bf16.msra.mxu0 %v454_v40  ;;  %vm302_vm3 = vcmp.ge.s32.totalorder %v575_v11, 32  ;;  %vm303_vm4 = vcmp.lt.s32.totalorder %v575_v11, 48  ;;  %vm306_vm6 = vcmask 1041408   ;;  %s489_s23 = scalar_lea.vmem %s329_s22, 32  ;;  %p494_p6 = scmp.lt.s32.totalorder %s329_s22, %s329_s22 }
  0x27   :  { %456 = vmatprep.subr.bf16.mxu0 %v516_v4  ;;  %v116_v14 = vadd.f32 %v363_v5, %v110_v10  ;;  %vm713_vm5 = vmand %vm302_vm3, %vm303_vm4  ;;  %p490_p5 = scmp.ne.s32.totalorder %s329_s22, %s489_s23  ;;  %p495_p7 = scmp.lt.s32.totalorder %s489_s23, %s489_s23 }
  0x29   :  { %v122_v18 = vadd.f32 %v365_v13, %v116_v14  ;;  %p496_p8 = por %p495_p7, %p494_p6 }
  0x2a   :  { %458 = vmatpush3.bf16.msra.mxu0 %v457_v3 }
  0x2b   :  { %459 = vmatprep.subr.bf16.mxu0 %v516_v4  ;;  %v128_v19 = vadd.f32 %v367_v16, %v122_v18  ;;  %p497_p9 = pnand %p496_p8, %p490_p5 }
  0x2d   :  { %v130_v20 = vsel %vm129_vm1, %v80_v17, %v128_v19 }
  0x2e   :  { %461 = vmatpush3.bf16.msra.mxu0 %v460_v15 }
  0x31   :  { %425 = vmatmul.mubr.f32.vlgmr.msra.gmra.mrb[0].mxu0 %v130_v20 }
 0x104   :  { %v213_v21 = vpop.f32.mrb[0].mxu0 }
 0x105   :  { %v426_v22 = vpop.f32.mrb[1].mxu0  ;;  %436 = vmatmul.mubr.msk.f32.vlgmr.msra.gmra.mrb[0].mxu1 %vm228_vm2, %v213_v21 }
 0x1d8   :  { %v298_v4 = vpop.f32.mrb[0].mxu1 }
 0x1d9   :  { %v299_v24 = vadd.f32 %v368_v7, %v298_v4  ;;  %v437_v25 = vpop.f32.mrb[1].mxu1 }
 0x1db   :  { %v305_v26 = vsel %vm713_vm5, %v299_v24, -inf }
 0x1dc   :  { %v307_v27 = vsel %vm306_vm6, %v305_v26, -inf }
 0x1dd   :  { %308 = vmax.xlane.f32.xlu0 %v307_v27 }
 0x26a   :  { %v309_v28 = vpop.xlane.xlu0 %308 }
 0x26b   :  { %v310_v29 = vsub.f32 %v299_v24, %v309_v28 }
 0x26d   :  { %v311_v11 = vmul.f32 1.442695, %v310_v29 }
 0x26f   :  { %473 = vpow2.f32 %v311_v11 }
 0x279   :  { %v474_v30 = vpop.eup %473 }
 0x27a   :  { %v313_v31 = vsel %vm713_vm5, %v474_v30, 0.0 }
 0x27b   :  { %v314_v32 = vsel %vm306_vm6, %v313_v31, 0.0 }
 0x27c   :  { %315 = vadd.xlane.f32.xlu0 %v314_v32 }
 0x309   :  { %v316_v33 = vpop.xlane.xlu0 %315 }
 0x30a   :  { %475 = vlog2.f32 %v316_v33 }
 0x314   :  { %v476_v34 = vpop.eup %475 }
 0x315   :  { %v318_v35 = vmul.f32 0.6931472, %v476_v34 }
 0x317   :  { %v319_v36 = vsub.f32 %v310_v29, %v318_v35 }
 0x319   :  { %v320_v37 = vsel %vm713_vm5, %v319_v36, %v299_v24 }
 0x31a   :  { %321 = vst [vmem:[#allocation5] sm:$0x3] %v320_v37 }
 0x31b   :  { %500 = shalt.err (!%p497_p9)
}
 0x31c   :  { %s501_s25 = scalar_lea.hbm %s739_s4, 32 }
 0x31d   :  { %p502_p10 = scmp.ne.s32.totalorder %s739_s4, %s501_s25  ;;  %p505_p11 = scmp.lt.u32.totalorder %s501_s25, %s739_s4 }
 0x31f   :  { %p507_p12 = pnand %p505_p11, %p502_p10 }
 0x321   :  { %510 = shalt.err (!%p507_p12)
}
 0x322   :  { %331 = dma.vmem_to_hbm [thread:$0]  %s329_s22, 32, %s739_s4, [#allocation3]  }
 0x323   :  { %513 = dma.done.wait [#allocation3], 32  }
 0x324   :  { %514 = vsyncadd [#allocation3], 4294967264 }
 0x325   :  { %335 = vsyncpa [#allocation3], 1 }
 0x326   :  { %336 = vsyncpa [#allocation4], 1 }

</bundles_post_ra>
